<compile_context>
chip_gen: v5e
topology: v5e:2x2
jax: 0.10.0
libtpu: 0.0.40
codegen_flags: <defaults>
</compile_context>

<pallas_src>
import functools
import math

import jax
import jax.numpy as jnp
from jax.experimental import pallas as pl
from jax.experimental.pallas import tpu as pltpu

_H1, _H2 = 256, 512
_LANE = 128
_SUBLANE = 8
_MAX_TILE_B = 512   # large-batch tile: fills 256-wide MXUs, ~<4 MiB working set


def _round_up(x, m):
    return ((x + m - 1) // m) * m


def _device_info():
    """Returns (is_v5_family, schedulable TCs per device). Heuristic only —
    affects perf knobs (epilogue dtype, tile split), never correctness."""
    try:
        kind = jax.devices()[0].device_kind.lower()
    except Exception:
        kind = ""
    is_v5 = ("v5" in kind)                                  # v5e / v5p: f32 VPU epilogue
    multi_tc = any(tag in kind for tag in ("v7", "7x", "v4", "v5p"))
    return is_v5, (2 if multi_tc else 1)


def _select_tile_b(batch, num_cores):
    """Pick the batch tile: tiny batches -> one sublane-aligned tile; large
    batches -> big tiles (<= _MAX_TILE_B), capped so multi-TC chips get >= 2
    grid steps."""
    batch = max(batch, 1)
    if batch <= _LANE:
        return _round_up(batch, _SUBLANE)
    padded = _round_up(batch, _SUBLANE)
    tile = min(_MAX_TILE_B, padded)
    if num_cores > 1:
        per_core = _round_up((padded + num_cores - 1) // num_cores, _SUBLANE)
        tile = min(tile, per_core)
    return max(tile, _SUBLANE)


def _fc_dqn_kernel(x_ref, w1_ref, b1_ref, w2_ref, b2_ref, w3_ref, b3_ref,
                   o_ref, *, bf16_epilogue):
    # Epilogue dtype: bf16 on v6e/v7x (bf16 VPU), f32 on the v5 family.
    act = jnp.bfloat16 if bf16_epilogue else jnp.float32

    # Layer 1: Linear(d_pad -> 256) + ReLU. bf16 MXU operands, f32 accumulate.
    x = x_ref[...].astype(jnp.bfloat16)
    h1 = jnp.dot(x, w1_ref[...], preferred_element_type=jnp.float32)
    h1 = jnp.maximum(h1.astype(act) + b1_ref[...].astype(act), 0.0)

    # Layer 2: Linear(256 -> 512) + ReLU. When bf16_epilogue, h1 is already
    # bf16 so there is no extra re-cast before the dot.
    h2 = jnp.dot(h1.astype(jnp.bfloat16), w2_ref[...],
                 preferred_element_type=jnp.float32)
    h2 = jnp.maximum(h2.astype(act) + b2_ref[...].astype(act), 0.0)

    # Layer 3: Linear(512 -> out_pad) — Q-values, no activation. out_pad = 128
    # keeps output stores lane-dense (unmasked vst); final bias-add in f32.
    q = jnp.dot(h2.astype(jnp.bfloat16), w3_ref[...],
                preferred_element_type=jnp.float32)
    o_ref[...] = (q + b3_ref[...]).astype(o_ref.dtype)


def fc_dqn_forward(observation, params, *, tile_b=None):
    """Pallas forward pass of FcDQN.

    observation: any shape that reshapes to (-1, input_dim)
    params: dict from init_params() — bf16 weights already padded to
            (d_pad, 256), (256, 512), (512, 128); f32 biases (1, N).
    tile_b: optional batch-tile override (sweepable); auto-selected otherwise.
    Returns (batch, output_dim) f32 Q-values.
    """
    w1, b1 = params["w1"], params["b1"]
    w2, b2 = params["w2"], params["b2"]
    w3, b3 = params["w3"], params["b3"]
    d_in = params["input_dim"]
    d_out = params["output_dim"]

    d_pad = w1.shape[0]      # input dim padded to sublane multiple
    out_pad = w3.shape[1]    # output dim padded to lane multiple (128)

    # Mirrors observation.view(-1, self.input_dim)
    x = observation.reshape(-1, d_in).astype(jnp.float32)
    batch = x.shape[0]

    is_v5, num_cores = _device_info()
    if tile_b is None:
        tile_b = _select_tile_b(batch, num_cores)
    tile_b = _round_up(max(int(tile_b), _SUBLANE), _SUBLANE)

    batch_pad = _round_up(max(batch, 1), tile_b)
    x = jnp.pad(x, ((0, batch_pad - batch), (0, d_pad - d_in)))

    grid = (batch_pad // tile_b,)

    # Weights / biases: constant index_map -> loaded into VMEM once, resident
    # across all batch tiles (x / out tiles are double-buffered by Pallas).
    def resident(shape):
        return pl.BlockSpec(shape, lambda i: (0,) * len(shape))

    kernel = functools.partial(_fc_dqn_kernel, bf16_epilogue=not is_v5)

    flops = 2 * batch_pad * (d_pad * _H1 + _H1 * _H2 + _H2 * out_pad)
    bytes_accessed = (
        x.size * 4                               # activations in
        + batch_pad * out_pad * 4                # activations out
        + (w1.size + w2.size + w3.size) * 2      # bf16 weights
        + (b1.size + b2.size + b3.size) * 4      # f32 biases
    )

    out = pl.pallas_call(
        kernel,
        out_shape=jax.ShapeDtypeStruct((batch_pad, out_pad), jnp.float32),
        grid=grid,
        in_specs=[
            pl.BlockSpec((tile_b, d_pad), lambda i: (i, 0)),  # x: batch-tiled
            resident(w1.shape), resident(b1.shape),
            resident(w2.shape), resident(b2.shape),
            resident(w3.shape), resident(b3.shape),
        ],
        out_specs=pl.BlockSpec((tile_b, out_pad), lambda i: (i, 0)),
        compiler_params=pltpu.CompilerParams(
            # Batch tiles are independent: shard across TensorCores on v7x.
            dimension_semantics=("parallel",),
        ),
        cost_estimate=pl.CostEstimate(
            flops=int(flops), transcendentals=0,
            bytes_accessed=int(bytes_accessed)),
    )(x, w1, b1, w2, b2, w3, b3)

    return out[:batch, :d_out]


def init_params(key, input_dim, output_dim):
    """PyTorch-style Linear init, stored (in, out), padded + cast for the TPU.

    w1 zero-padded along fan-in to a sublane multiple, w3/b3 zero-padded along
    fan-out to 128 lanes (padding is mathematically inert and sliced off in
    the wrapper). Weights are bf16 (MXU fast path), biases stay f32.
    """
    ks = jax.random.split(key, 6)

    def linear(kw, kb, fan_in, fan_out):
        bound = 1.0 / math.sqrt(fan_in)
        w = jax.random.uniform(kw, (fan_in, fan_out), jnp.float32,
                               -bound, bound)
        b = jax.random.uniform(kb, (1, fan_out), jnp.float32, -bound, bound)
        return w, b

    w1, b1 = linear(ks[0], ks[1], input_dim, _H1)
    w2, b2 = linear(ks[2], ks[3], _H1, _H2)
    w3, b3 = linear(ks[4], ks[5], _H2, output_dim)

    d_pad = max(_SUBLANE, _round_up(input_dim, _SUBLANE))
    out_pad = max(_LANE, _round_up(output_dim, _LANE))

    w1p = jnp.zeros((d_pad, _H1), jnp.float32).at[:input_dim, :].set(w1)
    w3p = jnp.zeros((_H2, out_pad), jnp.float32).at[:, :output_dim].set(w3)
    b3p = jnp.zeros((1, out_pad), jnp.float32).at[:, :output_dim].set(b3)

    return {
        "w1": w1p.astype(jnp.bfloat16), "b1": b1,
        "w2": w2.astype(jnp.bfloat16), "b2": b2,
        "w3": w3p.astype(jnp.bfloat16), "b3": b3p,
        "input_dim": input_dim, "output_dim": output_dim,
    }


def _reference_forward(observation, params, *, bf16_epilogue):
    """Plain-JAX reference with the same dtype policy as the kernel."""
    act = jnp.bfloat16 if bf16_epilogue else jnp.float32
    d_in = params["input_dim"]
    d_out = params["output_dim"]
    d_pad = params["w1"].shape[0]

    x = observation.reshape(-1, d_in).astype(jnp.float32)
    x = jnp.pad(x, ((0, 0), (0, d_pad - d_in)))

    h1 = jnp.dot(x.astype(jnp.bfloat16), params["w1"],
                 preferred_element_type=jnp.float32)
    h1 = jnp.maximum(h1.astype(act) + params["b1"].astype(act), 0.0)
    h2 = jnp.dot(h1.astype(jnp.bfloat16), params["w2"],
                 preferred_element_type=jnp.float32)
    h2 = jnp.maximum(h2.astype(act) + params["b2"].astype(act), 0.0)
    q = jnp.dot(h2.astype(jnp.bfloat16), params["w3"],
                preferred_element_type=jnp.float32) + params["b3"]
    return q[:, :d_out]


if __name__ == "__main__":
    # CartPole-v1: observation dim 4, action dim 2. Small batch of 8.
    input_dim, output_dim, batch = 4, 2, 8

    key = jax.random.PRNGKey(0)
    k_obs, k_params = jax.random.split(key)

    observation = jax.random.normal(k_obs, (batch, input_dim), jnp.float32)
    params = init_params(k_params, input_dim, output_dim)

    is_v5, _ = _device_info()

    # Small-batch path (single sublane-aligned tile, grid=(1,)).
    qvals = jax.block_until_ready(fc_dqn_forward(observation, params))
    ref = _reference_forward(observation, params, bf16_epilogue=not is_v5)
    assert qvals.shape == (batch, output_dim)
    assert jnp.allclose(qvals, ref, atol=1e-4, rtol=1e-4), (
        float(jnp.max(jnp.abs(qvals - ref))))

    # Sanity check vs. the pure-f32 PyTorch semantics (loose tol for bf16 MXU).
    xf = observation.reshape(-1, input_dim).astype(jnp.float32)
    w1f = params["w1"].astype(jnp.float32)[:input_dim]
    w3f = params["w3"].astype(jnp.float32)[:, :output_dim]
    h1f = jnp.maximum(xf @ w1f + params["b1"], 0.0)
    h2f = jnp.maximum(h1f @ params["w2"].astype(jnp.float32) + params["b2"], 0.0)
    qf = h2f @ w3f + params["b3"][:, :output_dim]
    assert jnp.allclose(qvals, qf, atol=5e-2, rtol=5e-2)

    # Multi-tile path (forces grid > 1, still tiny shapes).
    big_batch = 384
    big_obs = jax.random.normal(k_obs, (big_batch, input_dim), jnp.float32)
    big_q = jax.block_until_ready(
        fc_dqn_forward(big_obs, params, tile_b=128))
    big_ref = _reference_forward(big_obs, params, bf16_epilogue=not is_v5)
    assert big_q.shape == (big_batch, output_dim)
    assert jnp.allclose(big_q, big_ref, atol=1e-4, rtol=1e-4), (
        float(jnp.max(jnp.abs(big_q - big_ref))))

    print("KERNEL_OK")
</pallas_src>

<mosaic_0001>
module attributes {stable_mosaic.version = 11 : i64} {
  func.func @_fc_dqn_kernel(%arg0: i32, %arg1: memref<8x8xf32, #tpu.memory_space<vmem>>, %arg2: memref<8x256xbf16, #tpu.memory_space<vmem>>, %arg3: memref<1x256xf32, #tpu.memory_space<vmem>>, %arg4: memref<256x512xbf16, #tpu.memory_space<vmem>>, %arg5: memref<1x512xf32, #tpu.memory_space<vmem>>, %arg6: memref<512x128xbf16, #tpu.memory_space<vmem>>, %arg7: memref<1x128xf32, #tpu.memory_space<vmem>>, %arg8: memref<8x128xf32, #tpu.memory_space<vmem>>) attributes {dimension_semantics = [#tpu.dimension_semantics<parallel>], iteration_bounds = array<i64: 1>, scalar_prefetch = 0 : i64, scratch_operands = 0 : i64, tpu.core_type = #tpu.core_type<tc>, window_params = [{transform_indices = @transform_0, window_bounds = array<i64: 8, 8>}, {pipeline_mode = #tpu.pipeline_mode<synchronous>, transform_indices = @transform_1, window_bounds = array<i64: 8, 256>}, {pipeline_mode = #tpu.pipeline_mode<synchronous>, transform_indices = @transform_2, window_bounds = array<i64: 1, 256>}, {pipeline_mode = #tpu.pipeline_mode<synchronous>, transform_indices = @transform_3, window_bounds = array<i64: 256, 512>}, {pipeline_mode = #tpu.pipeline_mode<synchronous>, transform_indices = @transform_4, window_bounds = array<i64: 1, 512>}, {pipeline_mode = #tpu.pipeline_mode<synchronous>, transform_indices = @transform_5, window_bounds = array<i64: 512, 128>}, {pipeline_mode = #tpu.pipeline_mode<synchronous>, transform_indices = @transform_6, window_bounds = array<i64: 1, 128>}, {transform_indices = @transform_7, window_bounds = array<i64: 8, 128>}]} {
    %c0 = arith.constant 0 : index
    %c0_0 = arith.constant 0 : index
    %0 = vector.load %arg1[%c0, %c0_0] : memref<8x8xf32, #tpu.memory_space<vmem>>, vector<8x8xf32>
    %1 = arith.truncf %0 : vector<8x8xf32> to vector<8x8xbf16>
    %c0_1 = arith.constant 0 : index
    %c0_2 = arith.constant 0 : index
    %2 = vector.load %arg2[%c0_1, %c0_2] : memref<8x256xbf16, #tpu.memory_space<vmem>>, vector<8x256xbf16>
    %cst = arith.constant dense<0.000000e+00> : vector<8x256xf32>
    %3 = tpu.matmul %1, %2, %cst {dimension_numbers = #tpu.dot_dimension_numbers<[1], [0], [0], [1], [0, 0, 1, 1], [], []>} : vector<8x8xbf16>, vector<8x256xbf16>, vector<8x256xf32> -> vector<8x256xf32>
    %4 = arith.truncf %3 : vector<8x256xf32> to vector<8x256xbf16>
    %c0_3 = arith.constant 0 : index
    %c0_4 = arith.constant 0 : index
    %5 = vector.load %arg3[%c0_3, %c0_4] : memref<1x256xf32, #tpu.memory_space<vmem>>, vector<1x256xf32>
    %6 = arith.truncf %5 : vector<1x256xf32> to vector<1x256xbf16>
    %7 = vector.broadcast %6 : vector<1x256xbf16> to vector<8x256xbf16>
    %8 = arith.addf %4, %7 : vector<8x256xbf16>
    %cst_5 = arith.constant 0.000000e+00 : bf16
    %9 = vector.broadcast %cst_5 : bf16 to vector<8x256xbf16>
    %10 = arith.maximumf %8, %9 : vector<8x256xbf16>
    %c0_6 = arith.constant 0 : index
    %c0_7 = arith.constant 0 : index
    %11 = vector.load %arg4[%c0_6, %c0_7] : memref<256x512xbf16, #tpu.memory_space<vmem>>, vector<256x512xbf16>
    %cst_8 = arith.constant dense<0.000000e+00> : vector<8x512xf32>
    %12 = tpu.matmul %10, %11, %cst_8 {dimension_numbers = #tpu.dot_dimension_numbers<[1], [0], [0], [1], [0, 0, 1, 1], [], []>} : vector<8x256xbf16>, vector<256x512xbf16>, vector<8x512xf32> -> vector<8x512xf32>
    %13 = arith.truncf %12 : vector<8x512xf32> to vector<8x512xbf16>
    %c0_9 = arith.constant 0 : index
    %c0_10 = arith.constant 0 : index
    %14 = vector.load %arg5[%c0_9, %c0_10] : memref<1x512xf32, #tpu.memory_space<vmem>>, vector<1x512xf32>
    %15 = arith.truncf %14 : vector<1x512xf32> to vector<1x512xbf16>
    %16 = vector.broadcast %15 : vector<1x512xbf16> to vector<8x512xbf16>
    %17 = arith.addf %13, %16 : vector<8x512xbf16>
    %cst_11 = arith.constant 0.000000e+00 : bf16
    %18 = vector.broadcast %cst_11 : bf16 to vector<8x512xbf16>
    %19 = arith.maximumf %17, %18 : vector<8x512xbf16>
    %c0_12 = arith.constant 0 : index
    %c0_13 = arith.constant 0 : index
    %20 = vector.load %arg6[%c0_12, %c0_13] : memref<512x128xbf16, #tpu.memory_space<vmem>>, vector<512x128xbf16>
    %cst_14 = arith.constant dense<0.000000e+00> : vector<8x128xf32>
    %21 = tpu.matmul %19, %20, %cst_14 {dimension_numbers = #tpu.dot_dimension_numbers<[1], [0], [0], [1], [0, 0, 1, 1], [], []>} : vector<8x512xbf16>, vector<512x128xbf16>, vector<8x128xf32> -> vector<8x128xf32>
    %c0_15 = arith.constant 0 : index
    %c0_16 = arith.constant 0 : index
    %22 = vector.load %arg7[%c0_15, %c0_16] : memref<1x128xf32, #tpu.memory_space<vmem>>, vector<1x128xf32>
    %23 = vector.broadcast %22 : vector<1x128xf32> to vector<8x128xf32>
    %24 = arith.addf %21, %23 : vector<8x128xf32>
    %c0_17 = arith.constant 0 : index
    %c0_18 = arith.constant 0 : index
    %25 = vector.load %arg8[%c0_17, %c0_18] : memref<8x128xf32, #tpu.memory_space<vmem>>, vector<8x128xf32>
    tpu.vector_store %arg8[%c0_17, %c0_18], %24 {strides = array<i32>} : memref<8x128xf32, #tpu.memory_space<vmem>>, vector<8x128xf32>,
    return
  }
  func.func @transform_0(%arg0: i32) -> (i32, i32) {
    %c0_i32 = arith.constant 0 : i32
    %c0_i32_0 = arith.constant 0 : i32
    return %arg0, %c0_i32 : i32, i32
  }
  func.func @transform_1(%arg0: i32) -> (i32, i32) {
    %c0_i32 = arith.constant 0 : i32
    %c0_i32_0 = arith.constant 0 : i32
    %c0_i32_1 = arith.constant 0 : i32
    return %c0_i32, %c0_i32_0 : i32, i32
  }
  func.func @transform_2(%arg0: i32) -> (i32, i32) {
    %c0_i32 = arith.constant 0 : i32
    %c0_i32_0 = arith.constant 0 : i32
    %c0_i32_1 = arith.constant 0 : i32
    return %c0_i32, %c0_i32_0 : i32, i32
  }
  func.func @transform_3(%arg0: i32) -> (i32, i32) {
    %c0_i32 = arith.constant 0 : i32
    %c0_i32_0 = arith.constant 0 : i32
    %c0_i32_1 = arith.constant 0 : i32
    return %c0_i32, %c0_i32_0 : i32, i32
  }
  func.func @transform_4(%arg0: i32) -> (i32, i32) {
    %c0_i32 = arith.constant 0 : i32
    %c0_i32_0 = arith.constant 0 : i32
    %c0_i32_1 = arith.constant 0 : i32
    return %c0_i32, %c0_i32_0 : i32, i32
  }
  func.func @transform_5(%arg0: i32) -> (i32, i32) {
    %c0_i32 = arith.constant 0 : i32
    %c0_i32_0 = arith.constant 0 : i32
    %c0_i32_1 = arith.constant 0 : i32
    return %c0_i32, %c0_i32_0 : i32, i32
  }
  func.func @transform_6(%arg0: i32) -> (i32, i32) {
    %c0_i32 = arith.constant 0 : i32
    %c0_i32_0 = arith.constant 0 : i32
    %c0_i32_1 = arith.constant 0 : i32
    return %c0_i32, %c0_i32_0 : i32, i32
  }
  func.func @transform_7(%arg0: i32) -> (i32, i32) {
    %c0_i32 = arith.constant 0 : i32
    %c0_i32_0 = arith.constant 0 : i32
    return %arg0, %c0_i32 : i32, i32
  }
}

</mosaic_0001>

<bundles_post_ra>
// kernel: tpu_custom_call.1
= control target key start
LH: loop header
LB: loop body
LE: loop exit
PB: predicated region body
PF: predicated region fallthrough
CT: control target
= control target key end

     0   :  { %12 = vsyncpa [#allocation3], 0  ;;  %s1831_s0 = inlined_call_operand.hbm [shape: f32[8,8], index: 0, kind: input, shape index: {}]   ;;  %s1832_s1 = inlined_call_operand.hbm [shape: bf16[8,256], index: 1, kind: input, shape index: {}]   ;;  %s1833_s2 = inlined_call_operand.hbm [shape: f32[1,256], index: 2, kind: input, shape index: {}]   ;;  %s1834_s3 = inlined_call_operand.hbm [shape: bf16[256,512], index: 3, kind: input, shape index: {}]   ;;  %s1835_s4 = inlined_call_operand.hbm [shape: f32[1,512], index: 4, kind: input, shape index: {}]   ;;  %s1836_s5 = inlined_call_operand.hbm [shape: bf16[512,128], index: 5, kind: input, shape index: {}]   ;;  %s1837_s6 = inlined_call_operand.vmem [shape: f32[1,128], index: 6, kind: input, shape index: {}]   ;;  %s1838_s7 = inlined_call_operand.hbm [shape: f32[8,128], index: 7, kind: output, shape index: {}]  }
   0x1   :  { %13 = vsyncpa [#allocation6], 0 }
   0x2   :  { %14 = vsyncpa [#allocation9], 0 }
   0x3   :  { %15 = vsyncpa [#allocation12], 0  ;;  %s33_s26 = sshll.u32 %s1832_s1, 4  ;;  %s34_s26 = int_to_ptr.hbm [resolvable:$true] %s33_s26 }
   0x4   :  { %16 = vsyncpa [#allocation4], 0  ;;  %s1752_s27 = smov [#allocation5]   ;;  %s54_s8 = sshll.u32 %s1834_s3, 4  ;;  %s55_s8 = int_to_ptr.hbm [resolvable:$true] %s54_s8 }
   0x5   :  { %s35_s28 = sshll.u32 %s1752_s27, 4  ;;  %s1753_s9 = smov [#allocation8]   ;;  %s36_s28 = int_to_ptr.vmem [resolvable:$true] %s35_s28 }
   0x6   :  { %38 = dma.hbm_to_vmem [thread:$0]  %s34_s26, 128, %s36_s28, [#allocation6]  }
   0x7   :  { %s56_s10 = sshll.u32 %s1753_s9, 4  ;;  %s1754_s11 = smov 256   ;;  %s57_s10 = int_to_ptr.vmem [resolvable:$true] %s56_s10 }
   0x8   :  { %s1755_s12 = smov 16   ;;  %s22_s1 = sshll.u32 %s1831_s0, 4  ;;  %s23_s1 = int_to_ptr.hbm [resolvable:$true] %s22_s1 }
   0x9   :  { %62 = dma.hbm_to_vmem [thread:$0]  %s55_s8, 8192, %s57_s10, [#allocation9], %s1754_s11, %s1754_s11, %s1755_s12  }
   0xa   :  { %s1756_s15 = smov [#allocation2]   ;;  %s44_s3 = sshll.u32 %s1833_s2, 4  ;;  %s45_s3 = int_to_ptr.hbm [resolvable:$true] %s44_s3 }
   0xb   :  { %s24_s16 = sshll.u32 %s1756_s15, 4  ;;  %s1757_s19 = smov [#allocation7]   ;;  %s25_s16 = int_to_ptr.vmem [resolvable:$true] %s24_s16 }
   0xc   :  { %27 = dma.hbm_to_vmem [thread:$0]  %s23_s1, 128, %s25_s16, [#allocation3]  }
   0xd   :  { %s46_s20 = sshll.u32 %s1757_s19, 4  ;;  %s68_s23 = sshll.u32 %s1835_s4, 4  ;;  %s47_s20 = int_to_ptr.vmem [resolvable:$true] %s46_s20  ;;  %s69_s23 = int_to_ptr.hbm [resolvable:$true] %s68_s23 }
   0xe   :  { %49 = dma.hbm_to_vmem [thread:$0]  %s45_s3, 32, %s47_s20, [#allocation6]  }
   0xf   :  { %s78_s25 = sshll.u32 %s1836_s5, 4  ;;  %s1758_s26 = smov [#allocation10]   ;;  %s79_s25 = int_to_ptr.hbm [resolvable:$true] %s78_s25 }
  0x10   :  { %s70_s27 = sshll.u32 %s1758_s26, 4  ;;  %s1759_s2 = smov [#allocation11]   ;;  %s71_s27 = int_to_ptr.vmem [resolvable:$true] %s70_s27 }
  0x11   :  { %73 = dma.hbm_to_vmem [thread:$0]  %s69_s23, 64, %s71_s27, [#allocation9]  }
  0x12   :  { %s80_s28 = sshll.u32 %s1759_s2, 4  ;;  %s1760_s29 = smov 64   ;;  %s81_s28 = int_to_ptr.vmem [resolvable:$true] %s80_s28 }
  0x13   :  { %s1761_s30 = smov 4  }
  0x14   :  { %86 = dma.hbm_to_vmem [thread:$0]  %s79_s25, 4096, %s81_s28, [#allocation12], %s1760_s29, %s1760_s29, %s1761_s30  }
  0x15   :  { %1742 = dma.done.wait [#allocation3], 128  }
  0x16   :  { %1743 = vsyncadd [#allocation3], 4294967168 }
  0x17   :  { %1744 = dma.done.wait [#allocation6], 160  }
  0x18   :  { %1745 = vsyncadd [#allocation6], 4294967136 }
  0x19   :  { %1746 = dma.done.wait [#allocation9], 8256  }
  0x1a   :  { %1747 = vsyncadd [#allocation9], 4294959040 }
  0x1b   :  { %1748 = dma.done.wait [#allocation12], 4096  }
  0x1c   :  { %1749 = vsyncadd [#allocation12], 4294963200  ;;  %v116_v0 = vld [vmem:[#allocation5] sm:$0xff]  ;;  %vm126_vm0 = vcmask 1043456   ;;  %v114_v1 = vld [vmem:[#allocation2] sm:$0xff]  ;;  %vm122_vm1 = vcmask 64512  }
  0x1d   :  { %v1196_v2 = vld [vmem:[#allocation8 + $0xe0] sm:$0xf]  ;;  %v118_v3 = vunpack.c.l.b16 %v116_v0  ;;  %v119_v4 = vunpack.c.h.b16 %v116_v0  ;;  %v1496_v5 = vld [vmem:[#allocation8 + $0xec] sm:$0xf0]  ;;  %v1494_v10 = vld [vmem:[#allocation8 + $0xe4] sm:$0xf]  ;;  %v115_v26 = vpack.c.bf16 %v114_v1, %v114_v1 }
  0x1e   :  { %v1324_v6 = vld [vmem:[#allocation8 + $0x1e0] sm:$0xf]  ;;  %v1528_v7 = vld [vmem:[#allocation8 + $0x1ec] sm:$0xf0]  ;;  %v1197_v8 = vor.u32 %v1496_v5, %v1196_v2  ;;  %v1198_v11 = vld [vmem:[#allocation8 + $0xf0] sm:$0xf0] }
  0x1f   :  { %v1325_v9 = vor.u32 %v1528_v7, %v1324_v6  ;;  %v1526_v12 = vld [vmem:[#allocation8 + $0x1e4] sm:$0xf]  ;;  %v120_v13 = vpack.c.b16 %v118_v3, %v118_v3  ;;  %v121_v14 = vpack.c.b16 %v119_v4, %v119_v4  ;;  %v1201_v15 = vor.u32 %v1494_v10, %v1198_v11  ;;  %v1326_v16 = vld [vmem:[#allocation8 + $0x1f0] sm:$0xf0]  ;;  %v1180_v17 = vld [vmem:[#allocation8 + $0xc0] sm:$0xf] }
  0x20   :  { %v1492_v18 = vld [vmem:[#allocation8 + $0xcc] sm:$0xf0]  ;;  %577 = vmatpush.bf16.msra.mxu2 %v1197_v8  ;;  %v1329_v19 = vor.u32 %v1526_v12, %v1326_v16  ;;  %v1308_v21 = vld [vmem:[#allocation8 + $0x1c0] sm:$0xf]  ;;  %v1490_v23 = vld [vmem:[#allocation8 + $0xc4] sm:$0xf] }
  0x21   :  { %590 = vmatpush.bf16.msra.mxu3 %v1325_v9  ;;  %v1181_v20 = vor.u32 %v1492_v18, %v1180_v17  ;;  %v1524_v22 = vld [vmem:[#allocation8 + $0x1cc] sm:$0xf0]  ;;  %v128_v24 = vsel %vm126_vm0, %v120_v13, 0  ;;  %v131_v25 = vsel %vm126_vm0, %v121_v14, 0  ;;  %v1182_v28 = vld [vmem:[#allocation8 + $0xd0] sm:$0xf0] }
  0x22   :  { %v1309_v27 = vor.u32 %v1524_v22, %v1308_v21  ;;  %v1522_v29 = vld [vmem:[#allocation8 + $0x1c4] sm:$0xf]  ;;  %140 = vmatpush.bf16.msra.mxu0 %v128_v24  ;;  %153 = vmatpush.bf16.msra.mxu1 %v131_v25  ;;  %v1310_v30 = vld [vmem:[#allocation8 + $0x1d0] sm:$0xf0]  ;;  %v1164_v31 = vld [vmem:[#allocation8 + $0xa0] sm:$0xf]  ;;  %v1185_v33 = vor.u32 %v1490_v23, %v1182_v28 }
  0x23   :  { %v1488_v32 = vld [vmem:[#allocation8 + $0xac] sm:$0xf0]  ;;  %v1313_v34 = vor.u32 %v1522_v29, %v1310_v30  ;;  %v1292_v35 = vld [vmem:[#allocation8 + $0x1a0] sm:$0xf]  ;;  %v1486_v37 = vld [vmem:[#allocation8 + $0xa4] sm:$0xf] }
  0x24   :  { %v1520_v36 = vld [vmem:[#allocation8 + $0x1ac] sm:$0xf0]  ;;  %578 = vmatpush.bf16.msra.mxu2 %v1181_v20  ;;  %v1165_v38 = vor.u32 %v1488_v32, %v1164_v31  ;;  %v1166_v40 = vld [vmem:[#allocation8 + $0xb0] sm:$0xf0]  ;;  %v1518_v41 = vld [vmem:[#allocation8 + $0x1a4] sm:$0xf] }
  0x25   :  { %591 = vmatpush.bf16.msra.mxu3 %v1309_v27  ;;  %v1293_v39 = vor.u32 %v1520_v36, %v1292_v35  ;;  %v1294_v42 = vld [vmem:[#allocation8 + $0x1b0] sm:$0xf0]  ;;  %1080 = vmatmul.msk.bf16.vlgmr.msra.gmra.mxu0 %vm122_vm1, %v115_v26  ;;  %v1148_v43 = vld [vmem:[#allocation8 + $0x80] sm:$0xf]  ;;  %v1484_v44 = vld [vmem:[#allocation8 + $0x8c] sm:$0xf0]  ;;  %v1169_v47 = vor.u32 %v1486_v37, %v1166_v40 }
  0x26   :  { %603 = vmatpush.bf16.msrb.mxu0 %v1201_v15  ;;  %616 = vmatpush.bf16.msrb.mxu1 %v1329_v19  ;;  %v1276_v45 = vld [vmem:[#allocation8 + $0x180] sm:$0xf]  ;;  %v1516_v46 = vld [vmem:[#allocation8 + $0x18c] sm:$0xf0]  ;;  %v1297_v48 = vor.u32 %v1518_v41, %v1294_v42  ;;  %v1482_v49 = vld [vmem:[#allocation8 + $0x84] sm:$0xf]  ;;  %v1149_v51 = vor.u32 %v1484_v44, %v1148_v43 }
  0x27   :  { %1081 = vmatmul.msk.bf16.vlgmr.msra.gmra.mxu1 %vm122_vm1, %v115_v26  ;;  %v1150_v50 = vld [vmem:[#allocation8 + $0x90] sm:$0xf0]  ;;  %v1277_v52 = vor.u32 %v1516_v46, %v1276_v45  ;;  %v1514_v53 = vld [vmem:[#allocation8 + $0x184] sm:$0xf]  ;;  %v1132_v55 = vld [vmem:[#allocation8 + $0x60] sm:$0xf] }
  0x28   :  { %579 = vmatpush.bf16.msra.mxu2 %v1165_v38  ;;  %v1278_v54 = vld [vmem:[#allocation8 + $0x190] sm:$0xf0]  ;;  %v1480_v56 = vld [vmem:[#allocation8 + $0x6c] sm:$0xf0]  ;;  %v1260_v57 = vld [vmem:[#allocation8 + $0x160] sm:$0xf]  ;;  %v1153_v59 = vor.u32 %v1482_v49, %v1150_v50 }
  0x29   :  { %592 = vmatpush.bf16.msra.mxu3 %v1293_v39  ;;  %v1512_v58 = vld [vmem:[#allocation8 + $0x16c] sm:$0xf0]  ;;  %v1281_v60 = vor.u32 %v1514_v53, %v1278_v54  ;;  %v1478_v61 = vld [vmem:[#allocation8 + $0x64] sm:$0xf]  ;;  %v1134_v62 = vld [vmem:[#allocation8 + $0x70] sm:$0xf0]  ;;  %v1133_v63 = vor.u32 %v1480_v56, %v1132_v55 }
  0x2a   :  { %604 = vmatpush.bf16.msrb.mxu0 %v1185_v33  ;;  %617 = vmatpush.bf16.msrb.mxu1 %v1313_v34  ;;  %v1261_v0 = vor.u32 %v1512_v58, %v1260_v57  ;;  %v1510_v1 = vld [vmem:[#allocation8 + $0x164] sm:$0xf]  ;;  %v1262_v2 = vld [vmem:[#allocation8 + $0x170] sm:$0xf0]  ;;  %v1116_v3 = vld [vmem:[#allocation8 + $0x40] sm:$0xf]  ;;  %v1137_v7 = vor.u32 %v1478_v61, %v1134_v62 }
  0x2b   :  { %v1476_v4 = vld [vmem:[#allocation8 + $0x4c] sm:$0xf0]  ;;  %v1244_v5 = vld [vmem:[#allocation8 + $0x140] sm:$0xf]  ;;  %v1265_v8 = vor.u32 %v1510_v1, %v1262_v2  ;;  %v1474_v9 = vld [vmem:[#allocation8 + $0x44] sm:$0xf] }
  0x2c   :  { %580 = vmatpush.bf16.msra.mxu2 %v1149_v51  ;;  %v1508_v6 = vld [vmem:[#allocation8 + $0x14c] sm:$0xf0]  ;;  %v1118_v10 = vld [vmem:[#allocation8 + $0x50] sm:$0xf0]  ;;  %v1117_v11 = vor.u32 %v1476_v4, %v1116_v3  ;;  %v1506_v13 = vld [vmem:[#allocation8 + $0x144] sm:$0xf] }
  0x2d   :  { %593 = vmatpush.bf16.msra.mxu3 %v1277_v52  ;;  %v1245_v12 = vor.u32 %v1508_v6, %v1244_v5  ;;  %v1246_v14 = vld [vmem:[#allocation8 + $0x150] sm:$0xf0]  ;;  %v1100_v15 = vld [vmem:[#allocation8 + $0x20] sm:$0xf]  ;;  %v1472_v16 = vld [vmem:[#allocation8 + $0x2c] sm:$0xf0]  ;;  %v1121_v20 = vor.u32 %v1474_v9, %v1118_v10 }
  0x2e   :  { %605 = vmatpush.bf16.msrb.mxu0 %v1169_v47  ;;  %618 = vmatpush.bf16.msrb.mxu1 %v1297_v48  ;;  %v1228_v17 = vld [vmem:[#allocation8 + $0x120] sm:$0xf]  ;;  %v1504_v18 = vld [vmem:[#allocation8 + $0x12c] sm:$0xf0]  ;;  %v1470_v19 = vld [vmem:[#allocation8 + $0x24] sm:$0xf]  ;;  %v1249_v21 = vor.u32 %v1506_v13, %v1246_v14  ;;  %v1101_v25 = vor.u32 %v1472_v16, %v1100_v15 }
  0x2f   :  { %v1102_v22 = vld [vmem:[#allocation8 + $0x30] sm:$0xf0]  ;;  %v1502_v23 = vld [vmem:[#allocation8 + $0x124] sm:$0xf]  ;;  %v1229_v26 = vor.u32 %v1504_v18, %v1228_v17  ;;  %v1084_v27 = vld [vmem:[#allocation8] sm:$0xf] }
  0x30   :  { %581 = vmatpush.bf16.msra.mxu2 %v1133_v63  ;;  %v1230_v24 = vld [vmem:[#allocation8 + $0x130] sm:$0xf0]  ;;  %v1468_v28 = vld [vmem:[#allocation8 + $0xc] sm:$0xf0]  ;;  %v1212_v29 = vld [vmem:[#allocation8 + $0x100] sm:$0xf]  ;;  %v1105_v35 = vor.u32 %v1470_v19, %v1102_v22 }
  0x31   :  { %594 = vmatpush.bf16.msra.mxu3 %v1261_v0  ;;  %v1500_v30 = vld [vmem:[#allocation8 + $0x10c] sm:$0xf0]  ;;  %v1204_v31 = vld [vmem:[#allocation8 + $0xe8] sm:$0xf]  ;;  %v1497_v32 = vld [vmem:[#allocation8 + $0xf4] sm:$0xf0]  ;;  %v1233_v36 = vor.u32 %v1502_v23, %v1230_v24  ;;  %v1085_v39 = vor.u32 %v1468_v28, %v1084_v27 }
  0x32   :  { %606 = vmatpush.bf16.msrb.mxu0 %v1153_v59  ;;  %619 = vmatpush.bf16.msrb.mxu1 %v1281_v60  ;;  %v1332_v33 = vld [vmem:[#allocation8 + $0x1e8] sm:$0xf]  ;;  %v1529_v34 = vld [vmem:[#allocation8 + $0x1f4] sm:$0xf0]  ;;  %v1466_v37 = vld [vmem:[#allocation8 + $0x4] sm:$0xf]  ;;  %v1213_v40 = vor.u32 %v1500_v30, %v1212_v29  ;;  %v1205_v44 = vor.u32 %v1497_v32, %v1204_v31 }
  0x33   :  { %v1086_v38 = vld [vmem:[#allocation8 + $0x10] sm:$0xf0]  ;;  %v1498_v41 = vld [vmem:[#allocation8 + $0x104] sm:$0xf]  ;;  %v1495_v43 = vld [vmem:[#allocation8 + $0xec] sm:$0xf]  ;;  %v1333_v45 = vor.u32 %v1529_v34, %v1332_v33 }
  0x34   :  { %582 = vmatpush.bf16.msra.mxu2 %v1117_v11  ;;  %v1214_v42 = vld [vmem:[#allocation8 + $0x110] sm:$0xf0]  ;;  %v1206_v46 = vld [vmem:[#allocation8 + $0xf8] sm:$0xf0]  ;;  %v1527_v47 = vld [vmem:[#allocation8 + $0x1ec] sm:$0xf]  ;;  %v1089_v49 = vor.u32 %v1466_v37, %v1086_v38 }
  0x35   :  { %595 = vmatpush.bf16.msra.mxu3 %v1245_v12  ;;  %v1334_v48 = vld [vmem:[#allocation8 + $0x1f8] sm:$0xf0]  ;;  %v1217_v50 = vor.u32 %v1498_v41, %v1214_v42  ;;  %v1209_v51 = vor.u32 %v1495_v43, %v1206_v46  ;;  %v1188_v53 = vld [vmem:[#allocation8 + $0xc8] sm:$0xf]  ;;  %v1493_v54 = vld [vmem:[#allocation8 + $0xd4] sm:$0xf0] }
  0x36   :  { %607 = vmatpush.bf16.msrb.mxu0 %v1137_v7  ;;  %620 = vmatpush.bf16.msrb.mxu1 %v1265_v8  ;;  %v1337_v52 = vor.u32 %v1527_v47, %v1334_v48  ;;  %v1316_v55 = vld [vmem:[#allocation8 + $0x1c8] sm:$0xf]  ;;  %v1189_v56 = vor.u32 %v1493_v54, %v1188_v53  ;;  %v1525_v57 = vld [vmem:[#allocation8 + $0x1d4] sm:$0xf0]  ;;  %v1491_v58 = vld [vmem:[#allocation8 + $0xcc] sm:$0xf] }
  0x37   :  { %v1190_v59 = vld [vmem:[#allocation8 + $0xd8] sm:$0xf0]  ;;  %v1317_v60 = vor.u32 %v1525_v57, %v1316_v55  ;;  %v1523_v62 = vld [vmem:[#allocation8 + $0x1cc] sm:$0xf]  ;;  %v1172_v1 = vld [vmem:[#allocation8 + $0xa8] sm:$0xf] }
  0x38   :  { %583 = vmatpush.bf16.msra.mxu2 %v1101_v25  ;;  %v1193_v61 = vor.u32 %v1491_v58, %v1190_v59  ;;  %v1318_v63 = vld [vmem:[#allocation8 + $0x1d8] sm:$0xf0]  ;;  %v1489_v2 = vld [vmem:[#allocation8 + $0xb4] sm:$0xf0]  ;;  %v1300_v4 = vld [vmem:[#allocation8 + $0x1a8] sm:$0xf] }
  0x39   :  { %596 = vmatpush.bf16.msra.mxu3 %v1229_v26  ;;  %v1321_v0 = vor.u32 %v1523_v62, %v1318_v63  ;;  %v1173_v3 = vor.u32 %v1489_v2, %v1172_v1  ;;  %v1521_v5 = vld [vmem:[#allocation8 + $0x1b4] sm:$0xf0]  ;;  %v1487_v6 = vld [vmem:[#allocation8 + $0xac] sm:$0xf]  ;;  %v1174_v8 = vld [vmem:[#allocation8 + $0xb8] sm:$0xf0] }
  0x3a   :  { %608 = vmatpush.bf16.msrb.mxu0 %v1121_v20  ;;  %621 = vmatpush.bf16.msrb.mxu1 %v1249_v21  ;;  %v1301_v7 = vor.u32 %v1521_v5, %v1300_v4  ;;  %v1519_v9 = vld [vmem:[#allocation8 + $0x1ac] sm:$0xf]  ;;  %v1302_v10 = vld [vmem:[#allocation8 + $0x1b8] sm:$0xf0]  ;;  %v1177_v12 = vor.u32 %v1487_v6, %v1174_v8  ;;  %v1156_v14 = vld [vmem:[#allocation8 + $0x88] sm:$0xf] }
  0x3b   :  { %v160_v11 = vld [vmem:[#allocation7] sm:$0x3]  ;;  %v1305_v13 = vor.u32 %v1519_v9, %v1302_v10  ;;  %v1485_v15 = vld [vmem:[#allocation8 + $0x94] sm:$0xf0]  ;;  %v1284_v16 = vld [vmem:[#allocation8 + $0x188] sm:$0xf] }
  0x3c   :  { %584 = vmatpush.bf16.msra.mxu2 %v1085_v39  ;;  %v1157_v17 = vor.u32 %v1485_v15, %v1156_v14  ;;  %v1517_v18 = vld [vmem:[#allocation8 + $0x194] sm:$0xf0]  ;;  %v1483_v19 = vld [vmem:[#allocation8 + $0x8c] sm:$0xf]  ;;  %v1158_v20 = vld [vmem:[#allocation8 + $0x98] sm:$0xf0] }
  0x3d   :  { %597 = vmatpush.bf16.msra.mxu3 %v1213_v40  ;;  %v1285_v21 = vor.u32 %v1517_v18, %v1284_v16  ;;  %v1161_v22 = vor.u32 %v1483_v19, %v1158_v20  ;;  %v1515_v23 = vld [vmem:[#allocation8 + $0x18c] sm:$0xf]  ;;  %v1286_v24 = vld [vmem:[#allocation8 + $0x198] sm:$0xf0]  ;;  %v162_v26 = vperm.slane %v160_v11, 0  ;;  %v163_v27 = vperm.slane %v160_v11, 1 }
  0x3e   :  { %609 = vmatpush.bf16.msrb.mxu0 %v1105_v35  ;;  %622 = vmatpush.bf16.msrb.mxu1 %v1233_v36  ;;  %v1289_v25 = vor.u32 %v1515_v23, %v1286_v24  ;;  %v1140_v28 = vld [vmem:[#allocation8 + $0x68] sm:$0xf]  ;;  %v1481_v29 = vld [vmem:[#allocation8 + $0x74] sm:$0xf0]  ;;  %v1479_v33 = vld [vmem:[#allocation8 + $0x6c] sm:$0xf] }
  0x3f   :  { %v1268_v30 = vld [vmem:[#allocation8 + $0x168] sm:$0xf]  ;;  %v1141_v31 = vor.u32 %v1481_v29, %v1140_v28  ;;  %v1513_v32 = vld [vmem:[#allocation8 + $0x174] sm:$0xf0]  ;;  %v1142_v34 = vld [vmem:[#allocation8 + $0x78] sm:$0xf0]  ;;  %v166_v40 = vpack.c.bf16 %v163_v27, %v162_v26 }
  0x40   :  { %629 = vmatpush.bf16.msrb.mxu2 %v1205_v44  ;;  %v1269_v35 = vor.u32 %v1513_v32, %v1268_v30  ;;  %v1145_v36 = vor.u32 %v1479_v33, %v1142_v34  ;;  %v1511_v37 = vld [vmem:[#allocation8 + $0x16c] sm:$0xf]  ;;  %v1270_v38 = vld [vmem:[#allocation8 + $0x178] sm:$0xf0]  ;;  %v1124_v39 = vld [vmem:[#allocation8 + $0x48] sm:$0xf] }
  0x41   :  { %642 = vmatpush.bf16.msrb.mxu3 %v1333_v45  ;;  %v1273_v41 = vor.u32 %v1511_v37, %v1270_v38  ;;  %v1477_v42 = vld [vmem:[#allocation8 + $0x54] sm:$0xf0]  ;;  %v1252_v43 = vld [vmem:[#allocation8 + $0x148] sm:$0xf]  ;;  %v1475_v47 = vld [vmem:[#allocation8 + $0x4c] sm:$0xf]  ;;  %v168_v58 = vunpack.c.l.b16 %v166_v40  ;;  %v169_v59 = vunpack.c.h.b16 %v166_v40 }
  0x42   :  { %610 = vmatpush.bf16.msrb.mxu0 %v1089_v49  ;;  %623 = vmatpush.bf16.msrb.mxu1 %v1217_v50  ;;  %v1509_v44 = vld [vmem:[#allocation8 + $0x154] sm:$0xf0]  ;;  %v1125_v45 = vor.u32 %v1477_v42, %v1124_v39  ;;  %v1126_v48 = vld [vmem:[#allocation8 + $0x58] sm:$0xf0]  ;;  %v1507_v49 = vld [vmem:[#allocation8 + $0x14c] sm:$0xf] }
  0x43   :  { %v1253_v46 = vor.u32 %v1509_v44, %v1252_v43  ;;  %v1129_v50 = vor.u32 %v1475_v47, %v1126_v48  ;;  %v1473_v53 = vld [vmem:[#allocation8 + $0x34] sm:$0xf0]  ;;  %v1236_v55 = vld [vmem:[#allocation8 + $0x128] sm:$0xf]  ;;  %v1471_v57 = vld [vmem:[#allocation8 + $0x2c] sm:$0xf]  ;;  %v170_v11 = vpack.c.b16 %v168_v58, %v168_v58 }
  0x44   :  { %630 = vmatpush.bf16.msrb.mxu2 %v1189_v56  ;;  %v1505_v56 = vld [vmem:[#allocation8 + $0x134] sm:$0xf0]  ;;  %v1503_v62 = vld [vmem:[#allocation8 + $0x12c] sm:$0xf]  ;;  %v1238_v63 = vld [vmem:[#allocation8 + $0x138] sm:$0xf0] }
  0x45   :  { %643 = vmatpush.bf16.msrb.mxu3 %v1317_v60  ;;  %v1092_v2 = vld [vmem:[#allocation8 + $0x8] sm:$0xf]  ;;  %v1241_v5 = vor.u32 %v1503_v62, %v1238_v63  ;;  %v1501_v6 = vld [vmem:[#allocation8 + $0x114] sm:$0xf0]  ;;  %v1094_v8 = vld [vmem:[#allocation8 + $0x18] sm:$0xf0] }
  0x46   :  { %655 = vmatpush.bf16.msra.mxu0 %v1209_v51  ;;  %668 = vmatpush.bf16.msra.mxu1 %v1337_v52  ;;  %v1254_v51 = vld [vmem:[#allocation8 + $0x158] sm:$0xf0]  ;;  %v1108_v52 = vld [vmem:[#allocation8 + $0x28] sm:$0xf]  ;;  %v1499_v9 = vld [vmem:[#allocation8 + $0x10c] sm:$0xf] }
  0x47   :  { %v1257_v54 = vor.u32 %v1507_v49, %v1254_v51  ;;  %v1109_v60 = vor.u32 %v1473_v53, %v1108_v52  ;;  %v1220_v4 = vld [vmem:[#allocation8 + $0x108] sm:$0xf]  ;;  %v1222_v10 = vld [vmem:[#allocation8 + $0x118] sm:$0xf0]  ;;  %v1536_v38 = vld [vmem:[#allocation11 + $0x30] sm:$0xff]  ;;  %s1762_s8 = smov [#allocation13]  }
  0x48   :  { %631 = vmatpush.bf16.msrb.mxu2 %v1173_v3  ;;  %v1469_v3 = vld [vmem:[#allocation8 + $0x14] sm:$0xf0]  ;;  %v1221_v14 = vor.u32 %v1501_v6, %v1220_v4  ;;  %v1225_v16 = vor.u32 %v1499_v9, %v1222_v10  ;;  %v1545_v37 = vld [vmem:[#allocation11 + $0x78] sm:$0xff]  ;;  %v1535_v40 = vld [vmem:[#allocation11 + $0x28] sm:$0xff]  ;;  %s1065_s9 = sshll.u32 %s1762_s8, 4  ;;  %s1067_s12 = sshll.u32 %s1838_s7, 4  ;;  %s1066_s9 = int_to_ptr.vmem [resolvable:$true] %s1065_s9  ;;  %s1068_s12 = int_to_ptr.hbm [resolvable:$true] %s1067_s12 }
  0x49   :  { %644 = vmatpush.bf16.msrb.mxu3 %v1301_v7  ;;  %v1467_v7 = vld [vmem:[#allocation8 + $0xc] sm:$0xf]  ;;  %v1544_v39 = vld [vmem:[#allocation11 + $0x70] sm:$0xff]  ;;  %v1534_v42 = vld [vmem:[#allocation11 + $0x20] sm:$0xff] }
  0x4a   :  { %656 = vmatpush.bf16.msra.mxu0 %v1193_v61  ;;  %669 = vmatpush.bf16.msra.mxu1 %v1321_v0  ;;  %v1110_v61 = vld [vmem:[#allocation8 + $0x38] sm:$0xf0]  ;;  %v1237_v0 = vor.u32 %v1505_v56, %v1236_v55  ;;  %v1097_v15 = vor.u32 %v1467_v7, %v1094_v8  ;;  %v1542_v43 = vld [vmem:[#allocation11 + $0x60] sm:$0xff]  ;;  %v1532_v48 = vld [vmem:[#allocation11 + $0x10] sm:$0xff] }
  0x4b   :  { %v1113_v1 = vor.u32 %v1471_v57, %v1110_v61  ;;  %v1533_v44 = vld [vmem:[#allocation11 + $0x18] sm:$0xff]  ;;  %v1540_v49 = vld [vmem:[#allocation11 + $0x50] sm:$0xff]  ;;  %v1531_v52 = vld [vmem:[#allocation11 + $0x8] sm:$0xff] }
  0x4c   :  { %632 = vmatpush.bf16.msrb.mxu2 %v1157_v17  ;;  %v173_v17 = vpack.i.b16 %v170_v11, %v170_v11  ;;  %v1561_v47 = vld [vmem:[#allocation11 + $0xf8] sm:$0xff]  ;;  %v1560_v51 = vld [vmem:[#allocation11 + $0xf0] sm:$0xff]  ;;  %v1539_v53 = vld [vmem:[#allocation11 + $0x48] sm:$0xff] }
  0x4d   :  { %645 = vmatpush.bf16.msrb.mxu3 %v1285_v21  ;;  %v1559_v55 = vld [vmem:[#allocation11 + $0xe8] sm:$0xff]  ;;  %v683_v56 = vld [vmem:[#allocation10] sm:$0xf]  ;;  %v1530_v57 = vld [vmem:[#allocation11] sm:$0xff] }
  0x4e   :  { %657 = vmatpush.bf16.msra.mxu0 %v1177_v12  ;;  %670 = vmatpush.bf16.msra.mxu1 %v1305_v13  ;;  %v171_v12 = vpack.c.b16 %v169_v59, %v169_v59  ;;  %v1093_v13 = vor.u32 %v1469_v3, %v1092_v2  ;;  %v175_v19 = vperm.slane %v173_v17, 0  ;;  %v1538_v58 = vld [vmem:[#allocation11 + $0x40] sm:$0xff]  ;;  %v686_v61 = vperm.slane %v683_v56, 1  ;;  %v1549_v63 = vld [vmem:[#allocation11 + $0x98] sm:$0xff]  ;;  %v1548_v2 = vld [vmem:[#allocation11 + $0x90] sm:$0xff] }
  0x4f   :  { %v1550_v59 = vld [vmem:[#allocation11 + $0xa0] sm:$0xff]  ;;  %v1556_v3 = vld [vmem:[#allocation11 + $0xd0] sm:$0xff]  ;;  %v1547_v6 = vld [vmem:[#allocation11 + $0x88] sm:$0xff]  ;;  %v688_v17 = vperm.slane %v683_v56, 3 }
  0x50   :  { %633 = vmatpush.bf16.msrb.mxu2 %v1141_v31  ;;  %v177_v18 = vpack.i.b16 %v171_v12, %v171_v12  ;;  %v182_v24 = vunpack.c.l.bf16 %v175_v19  ;;  %v1558_v62 = vld [vmem:[#allocation11 + $0xe0] sm:$0xff]  ;;  %v1555_v7 = vld [vmem:[#allocation11 + $0xc8] sm:$0xff] }
  0x51   :  { %646 = vmatpush.bf16.msrb.mxu3 %v1269_v35  ;;  %v1546_v10 = vld [vmem:[#allocation11 + $0x80] sm:$0xff] }
  0x52   :  { %658 = vmatpush.bf16.msra.mxu0 %v1161_v22  ;;  %671 = vmatpush.bf16.msra.mxu1 %v1289_v25  ;;  %v179_v20 = vperm.slane %v177_v18, 0  ;;  %v1554_v11 = vld [vmem:[#allocation11 + $0xc0] sm:$0xff] }
  0x54   :  { %634 = vmatpush.bf16.msrb.mxu2 %v1125_v45  ;;  %v183_v25 = vunpack.c.l.bf16 %v179_v20  ;;  %v1541_v45 = vld [vmem:[#allocation11 + $0x58] sm:$0xff] }
  0x55   :  { %647 = vmatpush.bf16.msrb.mxu3 %v1253_v46  ;;  %v1553_v46 = vld [vmem:[#allocation11 + $0xb8] sm:$0xff] }
  0x56   :  { %659 = vmatpush.bf16.msra.mxu0 %v1145_v36  ;;  %672 = vmatpush.bf16.msra.mxu1 %v1273_v41  ;;  %v1537_v36 = vld [vmem:[#allocation11 + $0x38] sm:$0xff]  ;;  %v1543_v41 = vld [vmem:[#allocation11 + $0x68] sm:$0xff] }
  0x58   :  { %635 = vmatpush.bf16.msrb.mxu2 %v1109_v60  ;;  %v685_v60 = vperm.slane %v683_v56, 0 }
  0x59   :  { %648 = vmatpush.bf16.msrb.mxu3 %v1237_v0  ;;  %v1557_v0 = vld [vmem:[#allocation11 + $0xd8] sm:$0xff] }
  0x5a   :  { %660 = vmatpush.bf16.msra.mxu0 %v1129_v50  ;;  %673 = vmatpush.bf16.msra.mxu1 %v1257_v54  ;;  %v1552_v50 = vld [vmem:[#allocation11 + $0xb0] sm:$0xff]  ;;  %v1551_v54 = vld [vmem:[#allocation11 + $0xa8] sm:$0xff] }
  0x5c   :  { %636 = vmatpush.bf16.msrb.mxu2 %v1093_v13 }
  0x5d   :  { %649 = vmatpush.bf16.msrb.mxu3 %v1221_v14 }
  0x5e   :  { %661 = vmatpush.bf16.msra.mxu0 %v1113_v1  ;;  %674 = vmatpush.bf16.msra.mxu1 %v1241_v5  ;;  %v693_v1 = vpack.c.bf16 %v686_v61, %v685_v60 }
  0x60   :  { %v697_v4 = vunpack.c.l.b16 %v693_v1  ;;  %v698_v5 = vunpack.c.h.b16 %v693_v1 }
  0x62   :  { %662 = vmatpush.bf16.msra.mxu0 %v1097_v15  ;;  %675 = vmatpush.bf16.msra.mxu1 %v1225_v16  ;;  %v701_v8 = vpack.c.b16 %v697_v4, %v697_v4  ;;  %v702_v9 = vpack.c.b16 %v698_v5, %v698_v5  ;;  %v687_v16 = vperm.slane %v683_v56, 2 }
  0x64   :  { %v706_v12 = vpack.i.b16 %v701_v8, %v701_v8  ;;  %v710_v15 = vpack.i.b16 %v702_v9, %v702_v9  ;;  %v694_v20 = vpack.c.bf16 %v688_v17, %v687_v16 }
  0x66   :  { %v708_v18 = vperm.slane %v706_v12, 0  ;;  %v712_v19 = vperm.slane %v710_v15, 0 }
  0xa2   :  { %v142_v21 = vpop.f32.mrf.mxu0 }
  0xa4   :  { %v155_v22 = vpop.f32.mrf.mxu1 }
  0xa5   :  { %v159_v23 = vpack.c.bf16 %v155_v22, %v142_v21 }
  0xa7   :  { %v180_v26 = vunpack.c.l.bf16 %v159_v23  ;;  %v181_v27 = vunpack.c.h.bf16 %v159_v23 }
  0xa9   :  { %v184_v28 = vadd.f32 %v182_v24, %v180_v26  ;;  %v185_v29 = vadd.f32 %v183_v25, %v181_v27  ;;  %v725_v25 = vunpack.c.l.bf16 %v708_v18  ;;  %v726_v27 = vunpack.c.l.bf16 %v712_v19 }
  0xaa   :  { %v144_v32 = vpop.f32.mrf.mxu0 }
  0xab   :  { %v189_v30 = vmax.f32 %v184_v28, 0.0  ;;  %v190_v31 = vmax.f32 %v185_v29, 0.0 }
  0xac   :  { %v157_v33 = vpop.f32.mrf.mxu1 }
  0xad   :  { %v191_v34 = vpack.c.bf16 %v189_v30, %v189_v30  ;;  %v192_v35 = vpack.c.bf16 %v190_v31, %v190_v31  ;;  %v699_v30 = vunpack.c.l.b16 %v694_v20  ;;  %v700_v31 = vunpack.c.h.b16 %v694_v20 }
  0xaf   :  { %585 = vmatmul.bf16.vlgmr.msra.gmra.mxu2 %v191_v34  ;;  %598 = vmatmul.bf16.vlgmr.msra.gmra.mxu3 %v192_v35 }
  0xb0   :  { %611 = vmatmul.bf16.vlgmr.msrb.gmra.mxu0 %v191_v34  ;;  %624 = vmatmul.bf16.vlgmr.msrb.gmra.mxu1 %v192_v35 }
  0xb1   :  { %1007 = vmatpush.bf16.msra.mxu2 %v1537_v36  ;;  %1020 = vmatpush.bf16.msra.mxu3 %v1545_v37  ;;  %v703_v36 = vpack.c.b16 %v699_v30, %v699_v30  ;;  %v704_v37 = vpack.c.b16 %v700_v31, %v700_v31 }
  0xb2   :  { %1033 = vmatpush.bf16.msrb.mxu0 %v1553_v46  ;;  %1046 = vmatpush.bf16.msrb.mxu1 %v1561_v47 }
  0xb3   :  { %v714_v46 = vpack.i.b16 %v703_v36, %v703_v36  ;;  %v718_v47 = vpack.i.b16 %v704_v37, %v704_v37 }
  0xb5   :  { %1008 = vmatpush.bf16.msra.mxu2 %v1536_v38  ;;  %1021 = vmatpush.bf16.msra.mxu3 %v1544_v39 }
  0xb6   :  { %1034 = vmatpush.bf16.msrb.mxu0 %v1552_v50  ;;  %1047 = vmatpush.bf16.msrb.mxu1 %v1560_v51 }
  0xb9   :  { %1009 = vmatpush.bf16.msra.mxu2 %v1535_v40  ;;  %1022 = vmatpush.bf16.msra.mxu3 %v1543_v41 }
  0xba   :  { %1035 = vmatpush.bf16.msrb.mxu0 %v1551_v54  ;;  %1048 = vmatpush.bf16.msrb.mxu1 %v1559_v55 }
  0xbd   :  { %1010 = vmatpush.bf16.msra.mxu2 %v1534_v42  ;;  %1023 = vmatpush.bf16.msra.mxu3 %v1542_v43 }
  0xbe   :  { %1036 = vmatpush.bf16.msrb.mxu0 %v1550_v59  ;;  %1049 = vmatpush.bf16.msrb.mxu1 %v1558_v62 }
  0xbf   :  { %637 = vmatmul.bf16.vlgmr.msrb.gmra.mxu2 %v191_v34  ;;  %650 = vmatmul.bf16.vlgmr.msrb.gmra.mxu3 %v192_v35 }
  0xc0   :  { %663 = vmatmul.bf16.vlgmr.msra.gmra.mxu0 %v191_v34  ;;  %676 = vmatmul.bf16.vlgmr.msra.gmra.mxu1 %v192_v35 }
  0xc1   :  { %1011 = vmatpush.bf16.msra.mxu2 %v1533_v44  ;;  %1024 = vmatpush.bf16.msra.mxu3 %v1541_v45 }
  0xc2   :  { %1037 = vmatpush.bf16.msrb.mxu0 %v1549_v63  ;;  %1050 = vmatpush.bf16.msrb.mxu1 %v1557_v0 }
  0xc5   :  { %1012 = vmatpush.bf16.msra.mxu2 %v1532_v48  ;;  %1025 = vmatpush.bf16.msra.mxu3 %v1540_v49  ;;  %v716_v48 = vperm.slane %v714_v46, 0  ;;  %v720_v49 = vperm.slane %v718_v47, 0 }
  0xc6   :  { %1038 = vmatpush.bf16.msrb.mxu0 %v1548_v2  ;;  %1051 = vmatpush.bf16.msrb.mxu1 %v1556_v3 }
  0xc7   :  { %v727_v55 = vunpack.c.l.bf16 %v716_v48  ;;  %v728_v56 = vunpack.c.l.bf16 %v720_v49 }
  0xc9   :  { %1013 = vmatpush.bf16.msra.mxu2 %v1531_v52  ;;  %1026 = vmatpush.bf16.msra.mxu3 %v1539_v53 }
  0xca   :  { %1039 = vmatpush.bf16.msrb.mxu0 %v1547_v6  ;;  %1052 = vmatpush.bf16.msrb.mxu1 %v1555_v7  ;;  %v1573_v7 = vld [vmem:[%s1837_s6] ss:$0 sm:$0xff] }
  0xcd   :  { %1014 = vmatpush.bf16.msra.mxu2 %v1530_v57  ;;  %1027 = vmatpush.bf16.msra.mxu3 %v1538_v58 }
  0xce   :  { %1040 = vmatpush.bf16.msrb.mxu0 %v1546_v10  ;;  %1053 = vmatpush.bf16.msrb.mxu1 %v1554_v11 }
 0x12d   :  { %v612_v13 = vpop.f32.mrf.mxu0  ;;  %v625_v14 = vpop.f32.mrf.mxu1 }
 0x12e   :  { %v626_v23 = vadd.f32 %v625_v14, %v612_v13 }
 0x132   :  { %v586_v21 = vpop.f32.mrf.mxu2  ;;  %v599_v22 = vpop.f32.mrf.mxu3 }
 0x133   :  { %v600_v24 = vadd.f32 %v599_v22, %v586_v21 }
 0x135   :  { %v681_v26 = vpack.c.bf16 %v626_v23, %v600_v24  ;;  %v614_v28 = vpop.f32.mrf.mxu0  ;;  %v627_v29 = vpop.f32.mrf.mxu1 }
 0x137   :  { %v721_v32 = vunpack.c.l.bf16 %v681_v26  ;;  %v722_v33 = vunpack.c.h.bf16 %v681_v26 }
 0x139   :  { %v729_v34 = vadd.f32 %v725_v25, %v721_v32  ;;  %v730_v35 = vadd.f32 %v726_v27, %v722_v33 }
 0x13a   :  { %v588_v38 = vpop.f32.mrf.mxu2  ;;  %v601_v39 = vpop.f32.mrf.mxu3 }
 0x13b   :  { %v739_v40 = vmax.f32 %v729_v34, 0.0  ;;  %v740_v41 = vmax.f32 %v730_v35, 0.0 }
 0x13d   :  { %v664_v42 = vpop.f32.mrf.mxu0  ;;  %v677_v43 = vpop.f32.mrf.mxu1  ;;  %v743_v44 = vpack.c.bf16 %v739_v40, %v739_v40  ;;  %v744_v45 = vpack.c.bf16 %v740_v41, %v740_v41 }
 0x13e   :  { %v678_v52 = vadd.f32 %v677_v43, %v664_v42 }
 0x13f   :  { %1015 = vmatmul.bf16.vlgmr.msra.gmra.mxu2 %v743_v44  ;;  %1028 = vmatmul.bf16.vlgmr.msra.gmra.mxu3 %v744_v45 }
 0x142   :  { %v638_v50 = vpop.f32.mrf.mxu2  ;;  %v651_v51 = vpop.f32.mrf.mxu3 }
 0x143   :  { %v652_v53 = vadd.f32 %v651_v51, %v638_v50 }
 0x145   :  { %v682_v54 = vpack.c.bf16 %v678_v52, %v652_v53  ;;  %v666_v57 = vpop.f32.mrf.mxu0  ;;  %v679_v58 = vpop.f32.mrf.mxu1 }
 0x147   :  { %v723_v59 = vunpack.c.l.bf16 %v682_v54  ;;  %v724_v60 = vunpack.c.h.bf16 %v682_v54 }
 0x149   :  { %v731_v61 = vadd.f32 %v727_v55, %v723_v59  ;;  %v732_v62 = vadd.f32 %v728_v56, %v724_v60 }
 0x14a   :  { %v640_v63 = vpop.f32.mrf.mxu2  ;;  %v653_v0 = vpop.f32.mrf.mxu3 }
 0x14b   :  { %v741_v1 = vmax.f32 %v731_v61, 0.0  ;;  %v742_v2 = vmax.f32 %v732_v62, 0.0 }
 0x14d   :  { %v745_v3 = vpack.c.bf16 %v741_v1, %v741_v1  ;;  %v746_v4 = vpack.c.bf16 %v742_v2, %v742_v2 }
 0x14f   :  { %1041 = vmatmul.bf16.vlgmr.msrb.gmra.mxu0 %v745_v3  ;;  %1054 = vmatmul.bf16.vlgmr.msrb.gmra.mxu1 %v746_v4 }
 0x1c2   :  { %v1016_v5 = vpop.f32.mrf.mxu2  ;;  %v1029_v6 = vpop.f32.mrf.mxu3 }
 0x1c3   :  { %v1017_v8 = vadd.f32 %v1573_v7, %v1016_v5 }
 0x1c5   :  { %v1030_v11 = vadd.f32 %v1029_v6, %v1017_v8 }
 0x1ca   :  { %v1018_v9 = vpop.f32.mrf.mxu2  ;;  %v1031_v10 = vpop.f32.mrf.mxu3 }
 0x1cc   :  { %v1042_v12 = vpop.f32.mrf.mxu0  ;;  %v1055_v13 = vpop.f32.mrf.mxu1 }
 0x1cd   :  { %v1043_v14 = vadd.f32 %v1042_v12, %v1030_v11 }
 0x1cf   :  { %v1056_v15 = vadd.f32 %v1055_v13, %v1043_v14 }
 0x1d1   :  { %1059 = vst [vmem:[#allocation13] sm:$0xff] %v1056_v15 }
 0x1d2   :  { %1070 = dma.vmem_to_hbm [thread:$0]  %s1066_s9, 128, %s1068_s12, [#allocation4]  }
 0x1d4   :  { %v1044_v16 = vpop.f32.mrf.mxu0  ;;  %v1057_v17 = vpop.f32.mrf.mxu1 }
 0x1d5   :  { %1750 = dma.done.wait [#allocation4], 128  }
 0x1d6   :  { %1751 = vsyncadd [#allocation4], 4294967168 }
 0x1d7   :  { %1075 = vsyncpa [#allocation3], 1 }
 0x1d8   :  { %1076 = vsyncpa [#allocation6], 1 }
 0x1d9   :  { %1077 = vsyncpa [#allocation9], 1 }
 0x1da   :  { %1078 = vsyncpa [#allocation12], 1 }
 0x1db   :  { %1079 = vsyncpa [#allocation4], 1 }

</bundles_post_ra>
